<compile_context>
chip_gen: v7x
topology: tpu7x:2x2x1
jax: 0.10.0
libtpu: 0.0.40
codegen_flags: <defaults>
</compile_context>

<pallas_src>
import functools

import jax
import jax.numpy as jnp
from jax.experimental import pallas as pl
from jax.experimental.pallas import tpu as pltpu


def _round_up(x, m):
    return ((x + m - 1) // m) * m


def _kldiv_kernel(logits_ref, targets_ref, out_ref, *, inv_t, n_rows, tile_n):
    i = pl.program_id(0)

    x = logits_ref[...].astype(jnp.float32) * inv_t
    t = targets_ref[...].astype(jnp.float32) * inv_t

    # log_softmax(logits/T): only x_shift and lse_x are needed.
    x_max = jnp.max(x, axis=-1, keepdims=True)
    x_shift = x - x_max
    lse_x = jnp.log(jnp.sum(jnp.exp(x_shift), axis=-1, keepdims=True))

    # softmax(targets/T): unnormalized exp + row sums.
    t_max = jnp.max(t, axis=-1, keepdims=True)
    t_shift = t - t_max
    exp_t = jnp.exp(t_shift)
    sum_t = jnp.sum(exp_t, axis=-1, keepdims=True)

    # Per-row KL:  sum_c p * (log p - log q)
    #   = [sum_c exp_t * (t_shift - x_shift)] / sum_t + (lse_x - log sum_t)
    # The row-constant term is added per row, not broadcast over C.
    row = (
        jnp.sum(exp_t * (t_shift - x_shift), axis=-1, keepdims=True) / sum_t
        + (lse_x - jnp.log(sum_t))
    )  # (tile_n, 1)

    # The ragged last tile reads undefined VMEM for rows >= n_rows; any
    # NaN/Inf stays confined to those rows (row-local reductions only) and
    # is zeroed here before the block reduction.
    row_ids = i * tile_n + jax.lax.broadcasted_iota(jnp.int32, row.shape, 0)
    row = jnp.where(row_ids < n_rows, row, 0.0)

    # One scalar per block, written into a lane-dense (8, 128) output block
    # (unmasked full-tile store; host-side reduce is only num_blocks values).
    block_sum = jnp.sum(row)
    r = jax.lax.broadcasted_iota(jnp.int32, (8, 128), 0)
    c = jax.lax.broadcasted_iota(jnp.int32, (8, 128), 1)
    out_ref[...] = jnp.where((r == 0) & (c == 0), block_sum, 0.0)


def _pick_tile_and_vmem(n_rows, n_cols, in_itemsize):
    """Byte-targeted, VMEM-budgeted batch tile + vmem limit (per-chip aware)."""
    try:
        vmem_cap = int(pltpu.get_tpu_info().vmem_capacity_bytes)
    except Exception:
        vmem_cap = 64 * 1024 * 1024  # conservative (v7x-sized) fallback

    # dtype-native sublane multiple (bf16 packs 2 rows/sublane, int8/fp8: 4)
    if in_itemsize >= 4:
        sub = 8
    elif in_itemsize == 2:
        sub = 16
    else:
        sub = 32

    # Bytes per row live in VMEM: 2 inputs x 2 pipeline buffers of the input
    # dtype, plus ~4 live (tile_n, C) f32 temporaries inside the body.
    per_row = 2 * 2 * n_cols * in_itemsize + 4 * n_cols * 4

    budget = vmem_cap // 2  # headroom for output buffers / compiler scratch
    tile_budget = max(sub, budget // max(per_row, 1))

    # Byte target: ~6 MiB per input block per pipeline buffer amortizes the
    # ~0.35us/step overhead and keeps the kernel near the HBM roofline.
    target_block_bytes = 6 * 1024 * 1024
    tile_target = max(sub, target_block_bytes // max(n_cols * in_itemsize, 1))

    tile = min(tile_budget, tile_target)

    # Never exceed the (sublane-rounded) batch size.
    tile = min(tile, _round_up(max(n_rows, 1), sub))

    # Guarantee >=2 grid blocks when the batch permits, so the "parallel"
    # batch axis actually shards across both TensorCores on v7x.
    if n_rows >= 2 * sub:
        tile = min(tile, _round_up(pl.cdiv(n_rows, 2), sub))

    tile = max(sub, (tile // sub) * sub)

    need = per_row * tile + 2 * 8 * 128 * 4 + (1 << 20)
    vmem_limit = max(need + (4 << 20), 32 << 20)
    vmem_limit = min(vmem_limit, max(int(vmem_cap * 0.9), need + (1 << 20)))
    return tile, int(vmem_limit)


def kldiv_pallas(logits, targets, T=1.0, reduction="batchmean"):
    """KLDiv.forward equivalent. logits/targets: (N, C). Returns f32 scalar."""
    assert logits.shape == targets.shape and logits.ndim == 2
    N, C = logits.shape
    itemsize = max(jnp.dtype(logits.dtype).itemsize, jnp.dtype(targets.dtype).itemsize)

    tile_n, vmem_limit = _pick_tile_and_vmem(N, C, itemsize)
    num_blocks = pl.cdiv(N, tile_n)

    kernel = functools.partial(
        _kldiv_kernel, inv_t=1.0 / float(T), n_rows=N, tile_n=tile_n
    )

    cost = pl.CostEstimate(
        flops=10 * N * C,
        transcendentals=2 * N * C,
        bytes_accessed=2 * N * C * itemsize + num_blocks * 8 * 128 * 4,
    )

    per_block = pl.pallas_call(
        kernel,
        out_shape=jax.ShapeDtypeStruct((num_blocks * 8, 128), jnp.float32),
        grid_spec=pltpu.PrefetchScalarGridSpec(
            num_scalar_prefetch=0,
            grid=(num_blocks,),
            in_specs=[
                pl.BlockSpec((tile_n, C), lambda i: (i, 0)),
                pl.BlockSpec((tile_n, C), lambda i: (i, 0)),
            ],
            out_specs=pl.BlockSpec((8, 128), lambda i: (i, 0)),
        ),
        compiler_params=pltpu.CompilerParams(
            dimension_semantics=("parallel",),
            vmem_limit_bytes=vmem_limit,
        ),
        cost_estimate=cost,
    )(logits, targets)

    total = jnp.sum(per_block) * (float(T) * float(T))
    if reduction == "batchmean":
        return total / N
    elif reduction == "sum":
        return total
    elif reduction == "mean":
        return total / (N * C)
    else:
        raise NotImplementedError(f"unsupported reduction: {reduction}")


def _kldiv_ref(logits, targets, T=1.0):
    x = logits.astype(jnp.float32) / T
    t = targets.astype(jnp.float32) / T
    log_q = jax.nn.log_softmax(x, axis=1)
    p = jax.nn.softmax(t, axis=1)
    log_p = jax.nn.log_softmax(t, axis=1)
    return jnp.sum(p * (log_p - log_q)) / logits.shape[0] * (T * T)


if __name__ == "__main__":
    key = jax.random.PRNGKey(0)

    # even batch, f32
    k1, k2 = jax.random.split(key)
    N, C = 8, 32
    logits = jax.random.normal(k1, (N, C), dtype=jnp.float32)
    targets = jax.random.normal(k2, (N, C), dtype=jnp.float32)
    T = 2.0
    out = jax.block_until_ready(kldiv_pallas(logits, targets, T=T))
    ref = _kldiv_ref(logits, targets, T=T)
    assert jnp.allclose(out, ref, rtol=1e-5, atol=1e-5), (out, ref)

    # ragged batch (exercises the masked last tile)
    k3, k4 = jax.random.split(k1)
    N2, C2 = 12, 40
    logits2 = jax.random.normal(k3, (N2, C2), dtype=jnp.float32)
    targets2 = jax.random.normal(k4, (N2, C2), dtype=jnp.float32)
    out2 = jax.block_until_ready(kldiv_pallas(logits2, targets2, T=1.0))
    ref2 = _kldiv_ref(logits2, targets2, T=1.0)
    assert jnp.allclose(out2, ref2, rtol=1e-5, atol=1e-5), (out2, ref2)

    # multi-block ragged batch (>=2 grid blocks + masked last tile)
    k5, k6 = jax.random.split(k2)
    N3, C3 = 40, 48
    logits3 = jax.random.normal(k5, (N3, C3), dtype=jnp.float32)
    targets3 = jax.random.normal(k6, (N3, C3), dtype=jnp.float32)
    out3 = jax.block_until_ready(kldiv_pallas(logits3, targets3, T=3.0))
    ref3 = _kldiv_ref(logits3, targets3, T=3.0)
    assert jnp.allclose(out3, ref3, rtol=1e-5, atol=1e-5), (out3, ref3)

    # bf16 inputs (exercises the 16-row sublane rounding path)
    k7, k8 = jax.random.split(k3)
    N4, C4 = 16, 64
    logits4 = jax.random.normal(k7, (N4, C4), dtype=jnp.float32).astype(jnp.bfloat16)
    targets4 = jax.random.normal(k8, (N4, C4), dtype=jnp.float32).astype(jnp.bfloat16)
    out4 = jax.block_until_ready(kldiv_pallas(logits4, targets4, T=4.0))
    ref4 = _kldiv_ref(logits4, targets4, T=4.0)
    assert jnp.allclose(out4, ref4, rtol=1e-2, atol=1e-3), (out4, ref4)

    print("KERNEL_OK")
</pallas_src>

<mosaic_0001>
module attributes {stable_mosaic.version = 11 : i64} {
  func.func @_kldiv_kernel(%arg0: i32, %arg1: memref<8x32xf32, #tpu.memory_space<vmem>>, %arg2: memref<8x32xf32, #tpu.memory_space<vmem>>, %arg3: memref<8x128xf32, #tpu.memory_space<vmem>>) attributes {dimension_semantics = [#tpu.dimension_semantics<parallel>], iteration_bounds = array<i64: 1>, scalar_prefetch = 0 : i64, scratch_operands = 0 : i64, tpu.core_type = #tpu.core_type<tc>, window_params = [{transform_indices = @transform_0, window_bounds = array<i64: 8, 32>}, {transform_indices = @transform_1, window_bounds = array<i64: 8, 32>}, {transform_indices = @transform_2, window_bounds = array<i64: 8, 128>}]} {
    %c0 = arith.constant 0 : index
    %c0_0 = arith.constant 0 : index
    %0 = vector.load %arg1[%c0, %c0_0] : memref<8x32xf32, #tpu.memory_space<vmem>>, vector<8x32xf32>
    %cst = arith.constant 5.000000e-01 : f32
    %1 = vector.broadcast %cst : f32 to vector<8x32xf32>
    %2 = arith.mulf %0, %1 : vector<8x32xf32>
    %c0_1 = arith.constant 0 : index
    %c0_2 = arith.constant 0 : index
    %3 = vector.load %arg2[%c0_1, %c0_2] : memref<8x32xf32, #tpu.memory_space<vmem>>, vector<8x32xf32>
    %cst_3 = arith.constant 5.000000e-01 : f32
    %4 = vector.broadcast %cst_3 : f32 to vector<8x32xf32>
    %5 = arith.mulf %3, %4 : vector<8x32xf32>
    %cst_4 = arith.constant dense<0xFF800000> : vector<8xf32>
    %6 = vector.multi_reduction <maximumf>, %2, %cst_4 [1] : vector<8x32xf32> to vector<8xf32>
    %7 = vector.shape_cast %6 : vector<8xf32> to vector<8x1xf32>
    %8 = vector.broadcast %7 : vector<8x1xf32> to vector<8x32xf32>
    %9 = arith.subf %2, %8 : vector<8x32xf32>
    %10 = math.exp %9 : vector<8x32xf32>
    %cst_5 = arith.constant dense<0.000000e+00> : vector<8xf32>
    %11 = vector.multi_reduction <add>, %10, %cst_5 [1] : vector<8x32xf32> to vector<8xf32>
    %12 = vector.shape_cast %11 : vector<8xf32> to vector<8x1xf32>
    %13 = math.log %12 : vector<8x1xf32>
    %cst_6 = arith.constant dense<0xFF800000> : vector<8xf32>
    %14 = vector.multi_reduction <maximumf>, %5, %cst_6 [1] : vector<8x32xf32> to vector<8xf32>
    %15 = vector.shape_cast %14 : vector<8xf32> to vector<8x1xf32>
    %16 = vector.broadcast %15 : vector<8x1xf32> to vector<8x32xf32>
    %17 = arith.subf %5, %16 : vector<8x32xf32>
    %18 = math.exp %17 : vector<8x32xf32>
    %cst_7 = arith.constant dense<0.000000e+00> : vector<8xf32>
    %19 = vector.multi_reduction <add>, %18, %cst_7 [1] : vector<8x32xf32> to vector<8xf32>
    %20 = vector.shape_cast %19 : vector<8xf32> to vector<8x1xf32>
    %21 = arith.subf %17, %9 : vector<8x32xf32>
    %22 = arith.mulf %18, %21 : vector<8x32xf32>
    %cst_8 = arith.constant dense<0.000000e+00> : vector<8xf32>
    %23 = vector.multi_reduction <add>, %22, %cst_8 [1] : vector<8x32xf32> to vector<8xf32>
    %24 = vector.shape_cast %23 : vector<8xf32> to vector<8x1xf32>
    %25 = arith.divf %24, %20 : vector<8x1xf32>
    %26 = math.log %20 : vector<8x1xf32>
    %27 = arith.subf %13, %26 : vector<8x1xf32>
    %28 = arith.addf %25, %27 : vector<8x1xf32>
    %c8_i32 = arith.constant 8 : i32
    %29 = arith.muli %arg0, %c8_i32 : i32
    %30 = tpu.iota {dimensions = array<i32: 0>} : vector<8x1xi32>
    %31 = vector.broadcast %29 : i32 to vector<8x1xi32>
    %32 = arith.addi %31, %30 : vector<8x1xi32>
    %c8_i32_9 = arith.constant 8 : i32
    %33 = vector.broadcast %c8_i32_9 : i32 to vector<8x1xi32>
    %34 = arith.cmpi slt, %32, %33 : vector<8x1xi32>
    %cst_10 = arith.constant 0.000000e+00 : f32
    %35 = vector.broadcast %cst_10 : f32 to vector<8x1xf32>
    %36 = arith.select %34, %28, %35 : vector<8x1xi1>, vector<8x1xf32>
    %37 = vector.shape_cast %36 : vector<8x1xf32> to vector<1x8x1xf32>
    %cst_11 = arith.constant dense<0.000000e+00> : vector<1xf32>
    %38 = vector.multi_reduction <add>, %37, %cst_11 [1, 2] : vector<1x8x1xf32> to vector<1xf32>
    %39 = vector.shape_cast %38 : vector<1xf32> to vector<1x1x1xf32>
    %40 = vector.extract %39[0, 0, 0] : f32 from vector<1x1x1xf32>
    %41 = tpu.iota {dimensions = array<i32: 0>} : vector<8x128xi32>
    %42 = tpu.iota {dimensions = array<i32: 1>} : vector<8x128xi32>
    %c0_i32 = arith.constant 0 : i32
    %43 = vector.broadcast %c0_i32 : i32 to vector<8x128xi32>
    %44 = arith.cmpi eq, %41, %43 : vector<8x128xi32>
    %c0_i32_12 = arith.constant 0 : i32
    %45 = vector.broadcast %c0_i32_12 : i32 to vector<8x128xi32>
    %46 = arith.cmpi eq, %42, %45 : vector<8x128xi32>
    %47 = arith.andi %44, %46 : vector<8x128xi1>
    %cst_13 = arith.constant 0.000000e+00 : f32
    %48 = vector.broadcast %40 : f32 to vector<8x128xf32>
    %49 = vector.broadcast %cst_13 : f32 to vector<8x128xf32>
    %50 = arith.select %47, %48, %49 : vector<8x128xi1>, vector<8x128xf32>
    %c0_14 = arith.constant 0 : index
    %c0_15 = arith.constant 0 : index
    %51 = vector.load %arg3[%c0_14, %c0_15] : memref<8x128xf32, #tpu.memory_space<vmem>>, vector<8x128xf32>
    tpu.vector_store %arg3[%c0_14, %c0_15], %50 {strides = array<i32>} : memref<8x128xf32, #tpu.memory_space<vmem>>, vector<8x128xf32>,
    return
  }
  func.func @transform_0(%arg0: i32) -> (i32, i32) {
    %c0_i32 = arith.constant 0 : i32
    %c0_i32_0 = arith.constant 0 : i32
    return %arg0, %c0_i32 : i32, i32
  }
  func.func @transform_1(%arg0: i32) -> (i32, i32) {
    %c0_i32 = arith.constant 0 : i32
    %c0_i32_0 = arith.constant 0 : i32
    return %arg0, %c0_i32 : i32, i32
  }
  func.func @transform_2(%arg0: i32) -> (i32, i32) {
    %c0_i32 = arith.constant 0 : i32
    %c0_i32_0 = arith.constant 0 : i32
    return %arg0, %c0_i32 : i32, i32
  }
}

</mosaic_0001>

<bundles_post_ra>
// kernel: tpu_custom_call.1
= control target key start
LH: loop header
LB: loop body
LE: loop exit
PB: predicated region body
PF: predicated region fallthrough
CT: control target
= control target key end

     0   :  { %7 = vsyncpa [#allocation3], 0  ;;  %s260_s0 = inlined_call_operand.hbm [shape: f32[8,32], index: 0, kind: input, shape index: {}]   ;;  %s261_s1 = inlined_call_operand.hbm [shape: f32[8,32], index: 1, kind: input, shape index: {}]   ;;  %s262_s2 = inlined_call_operand.hbm [shape: f32[8,128], index: 2, kind: output, shape index: {}]  }
   0x1   :  { %8 = vsyncpa [#allocation6], 0 }
   0x2   :  { %9 = vsyncpa [#allocation4], 0  ;;  %s201_s9 = smov [#allocation2]   ;;  %s202_s11 = smov [#allocation5]  }
   0x3   :  { %s16_s10 = sshll.u32 %s201_s9, 4  ;;  %s26_s12 = sshll.u32 %s202_s11, 4  ;;  %s17_s10 = int_to_ptr.vmem [resolvable:$true] %s16_s10  ;;  %s27_s12 = int_to_ptr.vmem [resolvable:$true] %s26_s12 }
   0x4   :  { %s129_s15 = scalar_lea.hbm %s260_s0, 128 }
   0x5   :  { %p130_p0 = scmp.ne.s32.totalorder %s260_s0, %s129_s15  ;;  %p133_p1 = scmp.lt.u32.totalorder %s129_s15, %s260_s0 }
   0x7   :  { %p135_p2 = pnand %p133_p1, %p130_p0 }
   0x9   :  { %138 = shalt.err (!%p135_p2)
}
   0xa   :  { %s139_s20 = scalar_lea.vmem %s17_s10, 128  ;;  %p144_p4 = scmp.lt.s32.totalorder %s17_s10, %s17_s10 }
   0xb   :  { %p140_p3 = scmp.ne.s32.totalorder %s17_s10, %s139_s20  ;;  %p145_p5 = scmp.lt.s32.totalorder %s139_s20, %s139_s20 }
   0xd   :  { %p146_p6 = por %p145_p5, %p144_p4 }
   0xf   :  { %p147_p7 = pnand %p146_p6, %p140_p3 }
  0x11   :  { %150 = shalt.err (!%p147_p7)
}
  0x12   :  { %19 = dma.hbm_to_vmem [thread:$0]  %s260_s0, 128, %s17_s10, [#allocation3]  }
  0x13   :  { %s151_s25 = scalar_lea.hbm %s261_s1, 128 }
  0x14   :  { %p152_p8 = scmp.ne.s32.totalorder %s261_s1, %s151_s25  ;;  %p155_p9 = scmp.lt.u32.totalorder %s151_s25, %s261_s1 }
  0x16   :  { %p157_p10 = pnand %p155_p9, %p152_p8 }
  0x18   :  { %160 = shalt.err (!%p157_p10)
}
  0x19   :  { %s161_s30 = scalar_lea.vmem %s27_s12, 128  ;;  %p166_p12 = scmp.lt.s32.totalorder %s27_s12, %s27_s12 }
  0x1a   :  { %p162_p11 = scmp.ne.s32.totalorder %s27_s12, %s161_s30  ;;  %p167_p13 = scmp.lt.s32.totalorder %s161_s30, %s161_s30 }
  0x1c   :  { %p168_p0 = por %p167_p13, %p166_p12 }
  0x1e   :  { %p169_p1 = pnand %p168_p0, %p162_p11 }
  0x20   :  { %172 = shalt.err (!%p169_p1)
}
  0x21   :  { %29 = dma.hbm_to_vmem [thread:$0]  %s261_s1, 128, %s27_s12, [#allocation6]  }
  0x22   :  { %195 = dma.done.wait [#allocation3], 128  }
  0x23   :  { %196 = vsyncadd [#allocation3], 4294967168 }
  0x24   :  { %197 = dma.done.wait [#allocation6], 128  }
  0x25   :  { %198 = vsyncadd [#allocation6], 4294967168  ;;  %v36_v0 = vld [vmem:[#allocation2] sm:$0xff]  ;;  %vm40_vm0 = vcmask 261120   ;;  %v38_v1 = vld [vmem:[#allocation5] sm:$0xff]  ;;  %vm79_vm1 = vcmask 7168   ;;  %v73_v38 = vlaneseq }
  0x26   :  { %v37_v2 = vmul.f32 0.5, %v36_v0  ;;  %v39_v3 = vmul.f32 0.5, %v38_v1  ;;  %s203_s1 = smov [#allocation7]  }
  0x27   :  { %v74_v39 = vshrl.u32 %v73_v38, 7  ;;  %v91_v40 = vand.u32 127, %v73_v38  ;;  %s104_s4 = sshll.u32 %s203_s1, 4  ;;  %s105_s4 = int_to_ptr.vmem [resolvable:$true] %s104_s4 }
  0x28   :  { %v41_v4 = vsel %vm40_vm0, %v37_v2, -inf  ;;  %v52_v5 = vsel %vm40_vm0, %v39_v3, -inf  ;;  %s173_s6 = scalar_lea.vmem %s105_s4, 128  ;;  %p178_p3 = scmp.lt.s32.totalorder %s105_s4, %s105_s4 }
  0x29   :  { %42 = vmax.xlane.f32.xlu0 %v41_v4  ;;  %vm92_vm2 = vcmp.eq.s32.totalorder %v74_v39, 0  ;;  %vm93_vm3 = vcmp.eq.s32.totalorder %v91_v40, 0  ;;  %p174_p2 = scmp.ne.s32.totalorder %s105_s4, %s173_s6  ;;  %p179_p4 = scmp.lt.s32.totalorder %s173_s6, %s173_s6 }
  0x2a   :  { %vm94_vm4 = vmand %vm92_vm2, %vm93_vm3 }
  0x2b   :  { %p180_p5 = por %p179_p4, %p178_p3 }
  0x2d   :  { %53 = vmax.xlane.f32.xlu0 %v52_v5  ;;  %p181_p6 = pnand %p180_p5, %p174_p2 }
  0xb6   :  { %v43_v6 = vpop.xlane.xlu0 %42 }
  0xb7   :  { %v44_v7 = vsub.f32 %v37_v2, %v43_v6 }
  0xb9   :  { %v45_v8 = vmul.f32 1.442695, %v44_v7 }
  0xba   :  { %v54_v9 = vpop.xlane.xlu0 %53 }
  0xbb   :  { %119 = vpow2.f32 %v45_v8  ;;  %v55_v10 = vsub.f32 %v39_v3, %v54_v9 }
  0xbd   :  { %v56_v11 = vmul.f32 1.442695, %v55_v10  ;;  %v61_v14 = vsub.f32 %v55_v10, %v44_v7 }
  0xbf   :  { %121 = vpow2.f32 %v56_v11 }
  0xc5   :  { %v120_v12 = vpop.eup %119 }
  0xc6   :  { %v47_v13 = vsel %vm40_vm0, %v120_v12, 0.0 }
  0xc7   :  { %48 = vadd.xlane.f32.xlu1 %v47_v13 }
  0xc9   :  { %v122_v15 = vpop.eup %121 }
  0xca   :  { %v58_v16 = vsel %vm40_vm0, %v122_v15, 0.0  ;;  %v62_v17 = vmul.f32 %v122_v15, %v61_v14 }
  0xcb   :  { %59 = vadd.xlane.f32.xlu1 %v58_v16 }
  0xcc   :  { %v63_v18 = vsel %vm40_vm0, %v62_v17, 0.0 }
  0xcd   :  { %64 = vadd.xlane.f32.xlu0 %v63_v18 }
 0x154   :  { %v49_v19 = vpop.xlane.xlu1 %48 }
 0x155   :  { %123 = vlog2.f32 %v49_v19 }
 0x158   :  { %v60_v20 = vpop.xlane.xlu1 %59 }
 0x159   :  { %125 = vrcp.f32 %v60_v20 }
 0x15a   :  { %127 = vlog2.f32 %v60_v20  ;;  %v65_v26 = vpop.xlane.xlu0 %64 }
 0x15f   :  { %v124_v21 = vpop.eup %123 }
 0x160   :  { %v51_v24 = vmul.f32 0.6931472, %v124_v21 }
 0x163   :  { %v126_v22 = vpop.eup %125 }
 0x164   :  { %v128_v23 = vpop.eup %127  ;;  %v67_v27 = vmul.f32 %v126_v22, %v65_v26 }
 0x165   :  { %v69_v25 = vmul.f32 0.6931472, %v128_v23 }
 0x167   :  { %v70_v28 = vsub.f32 %v51_v24, %v69_v25 }
 0x169   :  { %v71_v29 = vadd.f32 %v70_v28, %v67_v27 }
 0x16b   :  { %v80_v30 = vsel %vm79_vm1, %v71_v29, 0.0 }
 0x16c   :  { %81 = vadd.xlane.f32.xlu1 %v80_v30 }
 0x1f9   :  { %v82_v31 = vpop.xlane.xlu1 %81 }
 0x1fa   :  { %v83_v32 = vrot.slane %v82_v31, 4 }
 0x1fc   :  { %v84_v33 = vadd.f32 %v83_v32, %v82_v31 }
 0x1fe   :  { %v85_v34 = vrot.slane %v84_v33, 2 }
 0x200   :  { %v86_v35 = vadd.f32 %v85_v34, %v84_v33 }
 0x202   :  { %v87_v36 = vrot.slane %v86_v35, 1 }
 0x204   :  { %v88_v37 = vadd.f32 %v87_v36, %v86_v35 }
 0x206   :  { %114 = vpush %v88_v37 }
 0x237   :  { %s115_s5 = spop %114 }
 0x238   :  { %v95_v41 = vstv %s115_s5 }
 0x239   :  { %v96_v42 = vsel %vm94_vm4, %v95_v41, 0.0 }
 0x23a   :  { %97 = vst [vmem:[#allocation7] sm:$0xff] %v96_v42 }
 0x23b   :  { %184 = shalt.err (!%p181_p6)
}
 0x23c   :  { %s185_s9 = scalar_lea.hbm %s262_s2, 128 }
 0x23d   :  { %p186_p7 = scmp.ne.s32.totalorder %s262_s2, %s185_s9  ;;  %p189_p8 = scmp.lt.u32.totalorder %s185_s9, %s262_s2 }
 0x23f   :  { %p191_p9 = pnand %p189_p8, %p186_p7 }
 0x241   :  { %194 = shalt.err (!%p191_p9)
}
 0x242   :  { %107 = dma.vmem_to_hbm [thread:$0]  %s105_s4, 128, %s262_s2, [#allocation4]  }
 0x243   :  { %199 = dma.done.wait [#allocation4], 128  }
 0x244   :  { %200 = vsyncadd [#allocation4], 4294967168 }
 0x245   :  { %111 = vsyncpa [#allocation3], 1 }
 0x246   :  { %112 = vsyncpa [#allocation6], 1 }
 0x247   :  { %113 = vsyncpa [#allocation4], 1 }

</bundles_post_ra>
